<compile_context>
chip_gen: v6e
topology: v6e:2x2x1
jax: 0.10.0
libtpu: 0.0.40
codegen_flags: <defaults>
</compile_context>

<pallas_src>
import jax
import jax.numpy as jnp
from jax.experimental import pallas as pl
from jax.experimental.pallas import tpu as pltpu


def _round_up(v, m):
    return ((v + m - 1) // m) * m


def _pad2d(a, rows, cols):
    pr, pc = rows - a.shape[0], cols - a.shape[1]
    if pr == 0 and pc == 0:
        return a
    return jnp.pad(a, ((0, pr), (0, pc)))


def _lora_kernel(x_ref, wT_ref, b_ref, mid_ref, bTs_ref, o_ref, acc_ref):
    # Grid = (M tiles, N tiles, K tiles); K is the sequential reduction axis.
    k = pl.program_id(2)

    @pl.when(k == 0)
    def _():
        # Prologue (overlaps the first W^T tile DMA of this (i, j) block):
        # acc = bias + (x @ A^T) @ (scaling * B^T).  mid / B^T stay in their
        # native (possibly bf16) dtype so the MXU runs its fast path; the
        # accumulation itself is f32.
        acc_ref[...] = (
            b_ref[...].astype(jnp.float32)
            + jnp.dot(mid_ref[...], bTs_ref[...],
                      preferred_element_type=jnp.float32))

    # Base path: accumulate x @ W^T in f32 (MXU-natural [M,K] x [K,N]).
    acc_ref[...] += jnp.dot(x_ref[...], wT_ref[...],
                            preferred_element_type=jnp.float32)

    @pl.when(k == pl.num_programs(2) - 1)
    def _():
        # Epilogue is just cast+store; all adds already folded into acc.
        o_ref[...] = acc_ref[...].astype(o_ref.dtype)


def _lora_forward(x2d, wT_p, bias_p, aT, bTs_p, *, dout, r_pad, tn, tk,
                  tm_default):
    M, _ = x2d.shape
    k_pad, n_pad = wT_p.shape
    itemsize = jnp.dtype(x2d.dtype).itemsize

    # dtype-aware sublane pack: 8 rows (f32) / 16 (bf16) / 32 (int8 / fp8).
    m_align = max(8, 32 // itemsize)
    tm = min(tm_default, _round_up(M, m_align))
    m_pad = _round_up(M, tm)
    # v7x has 2 TensorCores: if the parallel (i, j) grid collapsed to a single
    # tile, split M exactly in two (only when it costs no extra padding).
    if (m_pad // tm) * (n_pad // tn) == 1 and tm % (2 * m_align) == 0:
        tm //= 2

    # Hoisted LoRA mid path: tiny (M, r) matmul done once, outside the
    # kernel's (j, k) loops; cast back to the input dtype so the in-kernel
    # mid @ B^T matmul is MXU-native.
    mid = jnp.dot(x2d, aT, preferred_element_type=jnp.float32).astype(x2d.dtype)

    x_p = _pad2d(x2d, m_pad, k_pad)
    mid_p = _pad2d(mid, m_pad, r_pad)

    grid = (m_pad // tm, n_pad // tn, k_pad // tk)

    # Generation-specific VMEM budget (~48 MiB on v7x, ~96 MiB on v5e/v6e).
    tile_bytes = (2 * itemsize * (tm * tk + tk * tn + tm * r_pad
                                  + r_pad * tn + tn + tm * tn)
                  + 4 * tm * tn)
    try:
        vmem_cap = int(pltpu.get_tpu_info().vmem_capacity_bytes)
    except Exception:  # older jax / non-TPU trace: assume the smallest (v7x)
        vmem_cap = 64 * 2**20
    vmem_limit = int(min(max(2 * tile_bytes, 16 * 2**20), (3 * vmem_cap) // 4))

    flops = 2 * M * k_pad * n_pad + 2 * M * r_pad * n_pad
    bytes_accessed = itemsize * (x_p.size + wT_p.size + bias_p.size
                                 + mid_p.size + bTs_p.size + m_pad * n_pad)

    out_p = pl.pallas_call(
        _lora_kernel,
        out_shape=jax.ShapeDtypeStruct((m_pad, n_pad), x2d.dtype),
        grid_spec=pltpu.PrefetchScalarGridSpec(
            num_scalar_prefetch=0,
            grid=grid,
            in_specs=[
                pl.BlockSpec((tm, tk), lambda i, j, k: (i, k)),       # x
                pl.BlockSpec((tk, tn), lambda i, j, k: (k, j)),       # W^T
                pl.BlockSpec((1, tn), lambda i, j, k: (0, j)),        # bias
                pl.BlockSpec((tm, r_pad), lambda i, j, k: (i, 0)),    # x @ A^T
                pl.BlockSpec((r_pad, tn), lambda i, j, k: (0, j)),    # s * B^T
            ],
            out_specs=pl.BlockSpec((tm, tn), lambda i, j, k: (i, j)),
            scratch_shapes=[pltpu.VMEM((tm, tn), jnp.float32)],       # f32 acc
        ),
        compiler_params=pltpu.CompilerParams(
            dimension_semantics=("parallel", "parallel", "arbitrary"),
            vmem_limit_bytes=vmem_limit,
        ),
        cost_estimate=pl.CostEstimate(
            flops=int(flops), transcendentals=0,
            bytes_accessed=int(bytes_accessed)),
        # TODO(synk): on v5e, if profiling shows exposed W^T DMA, add
        # pipeline_mode=pl.Buffered(3) to the W^T BlockSpec and re-sweep.
    )(x_p, wT_p, bias_p, mid_p, bTs_p)

    return out_p[:M, :dout]


_lora_forward_jit = jax.jit(
    _lora_forward,
    static_argnames=("dout", "r_pad", "tn", "tk", "tm_default"))


def prepare_lora_params(weight, bias, lora_A, lora_B, *, alpha=16, r=16,
                        tn=512, tk=2048):
    """One-time layout plumbing: MXU-natural [K, N] operands, padded to tile
    multiples, with scaling = alpha / r folded into B^T.  Cache the result and
    call lora_linear_prepared() per step so the full weight is not re-streamed
    through HBM (transpose + pad) on every forward."""
    dout, din = weight.shape
    r_actual = lora_A.shape[0]
    scaling = float(alpha) / float(r)

    tn = min(tn, _round_up(dout, 128))
    tk = min(tk, _round_up(din, 128))
    # v7x (2 TensorCores): guarantee >=2 N tiles whenever the split is exact.
    if _round_up(dout, tn) // tn == 1 and tn >= 256 and tn % 256 == 0:
        tn //= 2
    r_pad = _round_up(r_actual, 128)     # lane-friendly LoRA rank
    n_pad = _round_up(dout, tn)
    k_pad = _round_up(din, tk)

    wT_p = _pad2d(weight.T, k_pad, n_pad)                       # (Din, Dout)
    bias_p = _pad2d(bias.reshape(1, dout), 1, n_pad)            # (1, Dout)
    aT = lora_A.T                                               # (Din, r)
    bTs = (lora_B.T.astype(jnp.float32) * scaling).astype(lora_B.dtype)
    bTs_p = _pad2d(bTs, r_pad, n_pad)                           # (r, Dout)

    arrays = (wT_p, bias_p, aT, bTs_p)
    meta = dict(dout=int(dout), r_pad=int(r_pad), tn=int(tn), tk=int(tk))
    return arrays, meta


def lora_linear_prepared(x, arrays, meta, *, tm=512):
    lead = x.shape[:-1]
    x2d = x.reshape(-1, x.shape[-1])
    out = _lora_forward_jit(x2d, *arrays, tm_default=int(tm), **meta)
    return out.reshape(*lead, meta["dout"])


def lora_linear(x, weight, bias, lora_A, lora_B, *, alpha=16, r=16,
                tm=512, tn=512, tk=2048):
    """Convenience one-shot API (re-prepares params on every call; prefer
    prepare_lora_params + lora_linear_prepared for repeated forward passes)."""
    arrays, meta = prepare_lora_params(weight, bias, lora_A, lora_B,
                                       alpha=alpha, r=r, tn=tn, tk=tk)
    return lora_linear_prepared(x, arrays, meta, tm=tm)


if __name__ == "__main__":
    def reference(x, weight, bias, lora_A, lora_B, alpha, r):
        scaling = alpha / r
        return (x @ weight.T + bias) + scaling * ((x @ lora_A.T) @ lora_B.T)

    key = jax.random.PRNGKey(0)

    # --- Case 1: module-default small shapes (f32), one-shot API -------------
    batch, in_features, out_features, r, alpha = 8, 32, 32, 16, 16
    kx, kw, ka, kb = jax.random.split(key, 4)
    w_bound = float(jnp.sqrt(6.0 / ((1.0 + 5.0) * in_features)))
    weight = jax.random.uniform(kw, (out_features, in_features), jnp.float32,
                                -w_bound, w_bound)
    bias = jnp.zeros((out_features,), jnp.float32)
    lora_A = jax.random.uniform(ka, (r, in_features), jnp.float32,
                                -w_bound, w_bound)
    # Module inits lora_B to zeros; use a small random B so the LoRA branch
    # actually exercises the kernel's prologue matmul.
    lora_B = 0.01 * jax.random.normal(kb, (out_features, r), jnp.float32)
    x = jax.random.normal(kx, (batch, in_features), jnp.float32)

    out = jax.block_until_ready(
        lora_linear(x, weight, bias, lora_A, lora_B, alpha=alpha, r=r))
    ref = reference(x, weight, bias, lora_A, lora_B, alpha, r)
    assert out.shape == (batch, out_features)
    assert jnp.allclose(out, ref, atol=1e-5, rtol=1e-5), "case-1 mismatch"

    # --- Case 2: bf16, ragged M, multi-tile N/K, prepared-params API ---------
    batch2, din2, dout2, r2, alpha2 = 200, 1024, 512, 16, 16
    k2 = jax.random.split(key, 5)
    x2 = jax.random.normal(k2[0], (batch2, din2), jnp.float32).astype(jnp.bfloat16)
    w2 = (0.02 * jax.random.normal(k2[1], (dout2, din2), jnp.float32)).astype(jnp.bfloat16)
    b2 = (0.5 * jax.random.normal(k2[2], (dout2,), jnp.float32)).astype(jnp.bfloat16)
    a2 = (0.02 * jax.random.normal(k2[3], (r2, din2), jnp.float32)).astype(jnp.bfloat16)
    bb2 = (0.05 * jax.random.normal(k2[4], (dout2, r2), jnp.float32)).astype(jnp.bfloat16)

    arrays2, meta2 = prepare_lora_params(w2, b2, a2, bb2, alpha=alpha2, r=r2)
    out2 = jax.block_until_ready(lora_linear_prepared(x2, arrays2, meta2))
    ref2 = reference(x2.astype(jnp.float32), w2.astype(jnp.float32),
                     b2.astype(jnp.float32), a2.astype(jnp.float32),
                     bb2.astype(jnp.float32), alpha2, r2)
    assert out2.shape == (batch2, dout2)
    assert jnp.allclose(out2.astype(jnp.float32), ref2, atol=2e-2, rtol=2e-2), \
        "case-2 mismatch"

    print("KERNEL_OK")
</pallas_src>

<mosaic_0001>
module attributes {stable_mosaic.version = 11 : i64} {
  func.func @_lora_kernel(%arg0: i32, %arg1: i32, %arg2: i32, %arg3: memref<8x128xf32, #tpu.memory_space<vmem>>, %arg4: memref<128x128xf32, #tpu.memory_space<vmem>>, %arg5: memref<1x128xf32, #tpu.memory_space<vmem>>, %arg6: memref<8x128xf32, #tpu.memory_space<vmem>>, %arg7: memref<128x128xf32, #tpu.memory_space<vmem>>, %arg8: memref<8x128xf32, #tpu.memory_space<vmem>>, %arg9: memref<8x128xf32, #tpu.memory_space<vmem>>) attributes {dimension_semantics = [#tpu.dimension_semantics<parallel>, #tpu.dimension_semantics<parallel>, #tpu.dimension_semantics<arbitrary>], iteration_bounds = array<i64: 1, 1, 1>, scalar_prefetch = 0 : i64, scratch_operands = 1 : i64, tpu.core_type = #tpu.core_type<tc>, window_params = [{transform_indices = @transform_0, window_bounds = array<i64: 8, 128>}, {transform_indices = @transform_1, window_bounds = array<i64: 128, 128>}, {transform_indices = @transform_2, window_bounds = array<i64: 1, 128>}, {transform_indices = @transform_3, window_bounds = array<i64: 8, 128>}, {transform_indices = @transform_4, window_bounds = array<i64: 128, 128>}, {transform_indices = @transform_5, window_bounds = array<i64: 8, 128>}]} {
    %c0_i32 = arith.constant 0 : i32
    %0 = arith.cmpi eq, %arg2, %c0_i32 : i32
    %1 = arith.extui %0 : i1 to i32
    %c0_i32_0 = arith.constant 0 : i32
    %2 = arith.cmpi ne, %1, %c0_i32_0 : i32
    scf.if %2 {
      %c0_10 = arith.constant 0 : index
      %c0_11 = arith.constant 0 : index
      %12 = vector.load %arg5[%c0_10, %c0_11] : memref<1x128xf32, #tpu.memory_space<vmem>>, vector<1x128xf32>
      %c0_12 = arith.constant 0 : index
      %c0_13 = arith.constant 0 : index
      %13 = vector.load %arg6[%c0_12, %c0_13] : memref<8x128xf32, #tpu.memory_space<vmem>>, vector<8x128xf32>
      %c0_14 = arith.constant 0 : index
      %c0_15 = arith.constant 0 : index
      %14 = vector.load %arg7[%c0_14, %c0_15] : memref<128x128xf32, #tpu.memory_space<vmem>>, vector<128x128xf32>
      %cst_16 = arith.constant dense<0.000000e+00> : vector<8x128xf32>
      %15 = tpu.matmul %13, %14, %cst_16 {dimension_numbers = #tpu.dot_dimension_numbers<[1], [0], [0], [1], [0, 0, 1, 1], [], []>} : vector<8x128xf32>, vector<128x128xf32>, vector<8x128xf32> -> vector<8x128xf32>
      %16 = vector.broadcast %12 : vector<1x128xf32> to vector<8x128xf32>
      %17 = arith.addf %16, %15 : vector<8x128xf32>
      %c0_17 = arith.constant 0 : index
      %c0_18 = arith.constant 0 : index
      %18 = vector.load %arg9[%c0_17, %c0_18] : memref<8x128xf32, #tpu.memory_space<vmem>>, vector<8x128xf32>
      tpu.vector_store %arg9[%c0_17, %c0_18], %17 {strides = array<i32>} : memref<8x128xf32, #tpu.memory_space<vmem>>, vector<8x128xf32>,
    } else {
    }
    %c0 = arith.constant 0 : index
    %c0_1 = arith.constant 0 : index
    %3 = vector.load %arg9[%c0, %c0_1] : memref<8x128xf32, #tpu.memory_space<vmem>>, vector<8x128xf32>
    %c0_2 = arith.constant 0 : index
    %c0_3 = arith.constant 0 : index
    %4 = vector.load %arg3[%c0_2, %c0_3] : memref<8x128xf32, #tpu.memory_space<vmem>>, vector<8x128xf32>
    %c0_4 = arith.constant 0 : index
    %c0_5 = arith.constant 0 : index
    %5 = vector.load %arg4[%c0_4, %c0_5] : memref<128x128xf32, #tpu.memory_space<vmem>>, vector<128x128xf32>
    %cst = arith.constant dense<0.000000e+00> : vector<8x128xf32>
    %6 = tpu.matmul %4, %5, %cst {dimension_numbers = #tpu.dot_dimension_numbers<[1], [0], [0], [1], [0, 0, 1, 1], [], []>} : vector<8x128xf32>, vector<128x128xf32>, vector<8x128xf32> -> vector<8x128xf32>
    %7 = arith.addf %3, %6 : vector<8x128xf32>
    %c0_6 = arith.constant 0 : index
    %c0_7 = arith.constant 0 : index
    %8 = vector.load %arg9[%c0_6, %c0_7] : memref<8x128xf32, #tpu.memory_space<vmem>>, vector<8x128xf32>
    tpu.vector_store %arg9[%c0_6, %c0_7], %7 {strides = array<i32>} : memref<8x128xf32, #tpu.memory_space<vmem>>, vector<8x128xf32>,
    %c0_i32_8 = arith.constant 0 : i32
    %9 = arith.cmpi eq, %arg2, %c0_i32_8 : i32
    %10 = arith.extui %9 : i1 to i32
    %c0_i32_9 = arith.constant 0 : i32
    %11 = arith.cmpi ne, %10, %c0_i32_9 : i32
    scf.if %11 {
      %c0_10 = arith.constant 0 : index
      %c0_11 = arith.constant 0 : index
      %12 = vector.load %arg9[%c0_10, %c0_11] : memref<8x128xf32, #tpu.memory_space<vmem>>, vector<8x128xf32>
      %c0_12 = arith.constant 0 : index
      %c0_13 = arith.constant 0 : index
      %13 = vector.load %arg8[%c0_12, %c0_13] : memref<8x128xf32, #tpu.memory_space<vmem>>, vector<8x128xf32>
      tpu.vector_store %arg8[%c0_12, %c0_13], %12 {strides = array<i32>} : memref<8x128xf32, #tpu.memory_space<vmem>>, vector<8x128xf32>,
    } else {
    }
    return
  }
  func.func @transform_0(%arg0: i32, %arg1: i32, %arg2: i32) -> (i32, i32) {
    %c0_i32 = arith.constant 0 : i32
    return %arg0, %arg2 : i32, i32
  }
  func.func @transform_1(%arg0: i32, %arg1: i32, %arg2: i32) -> (i32, i32) {
    %c0_i32 = arith.constant 0 : i32
    return %arg2, %arg1 : i32, i32
  }
  func.func @transform_2(%arg0: i32, %arg1: i32, %arg2: i32) -> (i32, i32) {
    %c0_i32 = arith.constant 0 : i32
    %c0_i32_0 = arith.constant 0 : i32
    return %c0_i32, %arg1 : i32, i32
  }
  func.func @transform_3(%arg0: i32, %arg1: i32, %arg2: i32) -> (i32, i32) {
    %c0_i32 = arith.constant 0 : i32
    %c0_i32_0 = arith.constant 0 : i32
    return %arg0, %c0_i32 : i32, i32
  }
  func.func @transform_4(%arg0: i32, %arg1: i32, %arg2: i32) -> (i32, i32) {
    %c0_i32 = arith.constant 0 : i32
    %c0_i32_0 = arith.constant 0 : i32
    return %c0_i32, %arg1 : i32, i32
  }
  func.func @transform_5(%arg0: i32, %arg1: i32, %arg2: i32) -> (i32, i32) {
    %c0_i32 = arith.constant 0 : i32
    return %arg0, %arg1 : i32, i32
  }
}

</mosaic_0001>

<bundles_post_ra>
// kernel: _lora_forward.1
= control target key start
LH: loop header
LB: loop body
LE: loop exit
PB: predicated region body
PF: predicated region fallthrough
CT: control target
= control target key end

     0   :  { %10 = vsyncpa [#allocation4], 0  ;;  %s527_s0 = inlined_call_operand.vmem [shape: f32[8,128], index: 0, kind: input, shape index: {}]   ;;  %s528_s1 = inlined_call_operand.hbm [shape: f32[128,128], index: 1, kind: input, shape index: {}]   ;;  %s529_s2 = inlined_call_operand.vmem [shape: f32[1,128], index: 2, kind: input, shape index: {}]   ;;  %s530_s3 = inlined_call_operand.vmem [shape: f32[8,128], index: 3, kind: input, shape index: {}]   ;;  %s531_s4 = inlined_call_operand.hbm [shape: f32[128,128], index: 4, kind: input, shape index: {}]   ;;  %s532_s5 = inlined_call_operand.hbm [shape: f32[8,128], index: 5, kind: output, shape index: {}]  }
   0x1   :  { %11 = vsyncpa [#allocation7], 0 }
   0x2   :  { %12 = vsyncpa [#allocation5], 0  ;;  %s438_s18 = smov [#allocation3]  }
   0x3   :  { %s20_s19 = sshll.u32 %s438_s18, 4  ;;  %s21_s19 = int_to_ptr.vmem [resolvable:$true] %s20_s19 }
   0x4   :  { %s380_s20 = scalar_lea.vmem %s21_s19, 2048  ;;  %p385_p1 = scmp.lt.s32.totalorder %s21_s19, %s21_s19 }
   0x5   :  { %p381_p0 = scmp.ne.s32.totalorder %s21_s19, %s380_s20  ;;  %p386_p2 = scmp.lt.s32.totalorder %s380_s20, %s380_s20 }
   0x7   :  { %p387_p3 = por %p386_p2, %p385_p1 }
   0x9   :  { %p388_p4 = pnand %p387_p3, %p381_p0 }
   0xb   :  { %391 = shalt.err (!%p388_p4)
}
   0xc   :  { %s439_s21 = smov 128   ;;  %s440_s22 = smov 8  }
   0xd   :  { %26 = dma.hbm_to_vmem [thread:$0]  %s528_s1, 2048, %s21_s19, [#allocation4], %s439_s21, %s439_s21, %s440_s22  }
   0xe   :  { %s441_s25 = smov [#allocation6]  }
   0xf   :  { %s36_s26 = sshll.u32 %s441_s25, 4  ;;  %s37_s26 = int_to_ptr.vmem [resolvable:$true] %s36_s26 }
  0x10   :  { %s400_s27 = scalar_lea.vmem %s37_s26, 2048  ;;  %p405_p6 = scmp.lt.s32.totalorder %s37_s26, %s37_s26 }
  0x11   :  { %p401_p5 = scmp.ne.s32.totalorder %s37_s26, %s400_s27  ;;  %p406_p7 = scmp.lt.s32.totalorder %s400_s27, %s400_s27 }
  0x13   :  { %p407_p8 = por %p406_p7, %p405_p6 }
  0x15   :  { %p408_p9 = pnand %p407_p8, %p401_p5 }
  0x17   :  { %411 = shalt.err (!%p408_p9)
}
  0x18   :  { %42 = dma.hbm_to_vmem [thread:$0]  %s531_s4, 2048, %s37_s26, [#allocation7], %s439_s21, %s439_s21, %s440_s22  }
  0x19   :  { %432 = dma.done.wait [#allocation4], 2048  }
  0x1a   :  { %433 = vsyncadd [#allocation4], 4294965248 }
  0x1b   :  { %434 = dma.done.wait [#allocation7], 2048  }
  0x1c   :  { %435 = vsyncadd [#allocation7], 4294965248  ;;  %v442_v0 = vmov 0.0   ;;  %vm443_vm0 = vmmov 0   ;;  %v70_v1 = vld [vmem:[#allocation6 + $0x78] sm:$0xff]  ;;  %v69_v3 = vld [vmem:[#allocation6 + $0x70] sm:$0xff] }
  0x1d   :  { %295 = vmatprep.subr.mxu0 %v442_v0  ;;  %330 = vmatprep.subr.mxu1 %v442_v0  ;;  %v166_v2 = vld [vmem:[#allocation3 + $0x78] sm:$0xff]  ;;  %v165_v4 = vld [vmem:[#allocation3 + $0x70] sm:$0xff]  ;;  %v68_v5 = vld [vmem:[#allocation6 + $0x68] sm:$0xff]  ;;  %s444_s9 = smov [#allocation8]  }
  0x1e   :  { %327 = vmatprep.mubr.msk.f32.mxu0 %vm443_vm0, %v442_v0  ;;  %362 = vmatprep.mubr.msk.f32.mxu1 %vm443_vm0, %v442_v0  ;;  %v164_v6 = vld [vmem:[#allocation3 + $0x68] sm:$0xff]  ;;  %v67_v7 = vld [vmem:[#allocation6 + $0x60] sm:$0xff]  ;;  %v66_v9 = vld [vmem:[#allocation6 + $0x58] sm:$0xff] }
  0x1f   :  { %296 = vmatpush3.msra.mxu0 %v70_v1  ;;  %331 = vmatpush3.msra.mxu1 %v166_v2  ;;  %v163_v8 = vld [vmem:[#allocation3 + $0x60] sm:$0xff]  ;;  %v162_v10 = vld [vmem:[#allocation3 + $0x58] sm:$0xff]  ;;  %v65_v11 = vld [vmem:[#allocation6 + $0x50] sm:$0xff] }
  0x20   :  { %297 = vmatprep.subr.mxu0 %v442_v0  ;;  %332 = vmatprep.subr.mxu1 %v442_v0  ;;  %v161_v12 = vld [vmem:[#allocation3 + $0x50] sm:$0xff]  ;;  %v64_v13 = vld [vmem:[#allocation6 + $0x48] sm:$0xff]  ;;  %v63_v15 = vld [vmem:[#allocation6 + $0x40] sm:$0xff] }
  0x21   :  { %298 = vmatpush3.msra.mxu0 %v69_v3  ;;  %333 = vmatpush3.msra.mxu1 %v165_v4  ;;  %v160_v14 = vld [vmem:[#allocation3 + $0x48] sm:$0xff]  ;;  %v159_v16 = vld [vmem:[#allocation3 + $0x40] sm:$0xff]  ;;  %v62_v17 = vld [vmem:[#allocation6 + $0x38] sm:$0xff] }
  0x22   :  { %299 = vmatprep.subr.mxu0 %v442_v0  ;;  %334 = vmatprep.subr.mxu1 %v442_v0  ;;  %v158_v18 = vld [vmem:[#allocation3 + $0x38] sm:$0xff]  ;;  %v61_v19 = vld [vmem:[#allocation6 + $0x30] sm:$0xff]  ;;  %v60_v21 = vld [vmem:[#allocation6 + $0x28] sm:$0xff] }
  0x23   :  { %300 = vmatpush3.msra.mxu0 %v68_v5  ;;  %335 = vmatpush3.msra.mxu1 %v164_v6  ;;  %v157_v20 = vld [vmem:[#allocation3 + $0x30] sm:$0xff]  ;;  %v156_v22 = vld [vmem:[#allocation3 + $0x28] sm:$0xff]  ;;  %v59_v23 = vld [vmem:[#allocation6 + $0x20] sm:$0xff] }
  0x24   :  { %301 = vmatprep.subr.mxu0 %v442_v0  ;;  %336 = vmatprep.subr.mxu1 %v442_v0  ;;  %v155_v24 = vld [vmem:[#allocation3 + $0x20] sm:$0xff]  ;;  %v58_v25 = vld [vmem:[#allocation6 + $0x18] sm:$0xff]  ;;  %v57_v27 = vld [vmem:[#allocation6 + $0x10] sm:$0xff] }
  0x25   :  { %302 = vmatpush3.msra.mxu0 %v67_v7  ;;  %337 = vmatpush3.msra.mxu1 %v163_v8  ;;  %v154_v26 = vld [vmem:[#allocation3 + $0x18] sm:$0xff]  ;;  %v153_v28 = vld [vmem:[#allocation3 + $0x10] sm:$0xff]  ;;  %v56_v29 = vld [vmem:[#allocation6 + $0x8] sm:$0xff] }
  0x26   :  { %303 = vmatprep.subr.mxu0 %v442_v0  ;;  %338 = vmatprep.subr.mxu1 %v442_v0  ;;  %v152_v30 = vld [vmem:[#allocation3 + $0x8] sm:$0xff]  ;;  %v55_v31 = vld [vmem:[#allocation6] sm:$0xff] }
  0x27   :  { %304 = vmatpush3.msra.mxu0 %v66_v9  ;;  %339 = vmatpush3.msra.mxu1 %v162_v10  ;;  %v151_v32 = vld [vmem:[#allocation3] sm:$0xff] }
  0x28   :  { %305 = vmatprep.subr.mxu0 %v442_v0  ;;  %340 = vmatprep.subr.mxu1 %v442_v0  ;;  %v54_v33 = vld [vmem:[%s530_s3] sm:$0xff]  ;;  %s250_s3 = sshll.u32 %s444_s9, 4  ;;  %s251_s3 = int_to_ptr.vmem [resolvable:$true] %s250_s3 }
  0x29   :  { %306 = vmatpush3.msra.mxu0 %v65_v11  ;;  %341 = vmatpush3.msra.mxu1 %v161_v12  ;;  %v150_v34 = vld [vmem:[%s527_s0] sm:$0xff]  ;;  %s412_s0 = scalar_lea.vmem %s251_s3, 128  ;;  %p417_p11 = scmp.lt.s32.totalorder %s251_s3, %s251_s3 }
  0x2a   :  { %307 = vmatprep.subr.mxu0 %v442_v0  ;;  %342 = vmatprep.subr.mxu1 %v442_v0  ;;  %v260_v35 = vld [vmem:[%s529_s2] ss:$0 sm:$0xff]  ;;  %p413_p10 = scmp.ne.s32.totalorder %s251_s3, %s412_s0  ;;  %p418_p12 = scmp.lt.s32.totalorder %s412_s0, %s412_s0 }
  0x2b   :  { %308 = vmatpush3.msra.mxu0 %v64_v13  ;;  %343 = vmatpush3.msra.mxu1 %v160_v14 }
  0x2c   :  { %309 = vmatprep.subr.mxu0 %v442_v0  ;;  %344 = vmatprep.subr.mxu1 %v442_v0  ;;  %p419_p13 = por %p418_p12, %p417_p11 }
  0x2d   :  { %310 = vmatpush3.msra.mxu0 %v63_v15  ;;  %345 = vmatpush3.msra.mxu1 %v159_v16 }
  0x2e   :  { %311 = vmatprep.subr.mxu0 %v442_v0  ;;  %346 = vmatprep.subr.mxu1 %v442_v0  ;;  %p420_p0 = pnand %p419_p13, %p413_p10 }
  0x2f   :  { %312 = vmatpush3.msra.mxu0 %v62_v17  ;;  %347 = vmatpush3.msra.mxu1 %v158_v18 }
  0x30   :  { %313 = vmatprep.subr.mxu0 %v442_v0  ;;  %348 = vmatprep.subr.mxu1 %v442_v0 }
  0x31   :  { %314 = vmatpush3.msra.mxu0 %v61_v19  ;;  %349 = vmatpush3.msra.mxu1 %v157_v20 }
  0x32   :  { %315 = vmatprep.subr.mxu0 %v442_v0  ;;  %350 = vmatprep.subr.mxu1 %v442_v0 }
  0x33   :  { %316 = vmatpush3.msra.mxu0 %v60_v21  ;;  %351 = vmatpush3.msra.mxu1 %v156_v22 }
  0x34   :  { %317 = vmatprep.subr.mxu0 %v442_v0  ;;  %352 = vmatprep.subr.mxu1 %v442_v0 }
  0x35   :  { %318 = vmatpush3.msra.mxu0 %v59_v23  ;;  %353 = vmatpush3.msra.mxu1 %v155_v24 }
  0x36   :  { %319 = vmatprep.subr.mxu0 %v442_v0  ;;  %354 = vmatprep.subr.mxu1 %v442_v0 }
  0x37   :  { %320 = vmatpush3.msra.mxu0 %v58_v25  ;;  %355 = vmatpush3.msra.mxu1 %v154_v26 }
  0x38   :  { %321 = vmatprep.subr.mxu0 %v442_v0  ;;  %356 = vmatprep.subr.mxu1 %v442_v0 }
  0x39   :  { %322 = vmatpush3.msra.mxu0 %v57_v27  ;;  %357 = vmatpush3.msra.mxu1 %v153_v28 }
  0x3a   :  { %323 = vmatprep.subr.mxu0 %v442_v0  ;;  %358 = vmatprep.subr.mxu1 %v442_v0 }
  0x3b   :  { %324 = vmatpush3.msra.mxu0 %v56_v29  ;;  %359 = vmatpush3.msra.mxu1 %v152_v30 }
  0x3c   :  { %325 = vmatprep.subr.mxu0 %v442_v0  ;;  %360 = vmatprep.subr.mxu1 %v442_v0 }
  0x3d   :  { %326 = vmatpush3.msra.mxu0 %v55_v31  ;;  %361 = vmatpush3.msra.mxu1 %v151_v32 }
  0x3e   :  { %328 = vmatmul.mubr.f32.vlgmr.msra.gmra.mxu0 %v54_v33  ;;  %363 = vmatmul.mubr.f32.vlgmr.msra.gmra.mxu1 %v150_v34 }
  0xfe   :  { %v137_v36 = vpop.f32.mrf.mxu0  ;;  %v233_v37 = vpop.f32.mrf.mxu1 }
  0xff   :  { %v147_v38 = vadd.f32 %v260_v35, %v137_v36 }
 0x100   :  { %v329_v39 = vpop.f32.mrf.mxu0  ;;  %v364_v40 = vpop.f32.mrf.mxu1 }
 0x101   :  { %v237_v41 = vadd.f32 %v233_v37, %v147_v38 }
 0x103   :  { %243 = vst [vmem:[#allocation8] sm:$0xff] %v237_v41 }
 0x104   :  { %423 = shalt.err (!%p420_p0)
}
 0x105   :  { %253 = dma.vmem_to_hbm [thread:$0]  %s251_s3, 128, %s532_s5, [#allocation5]  }
 0x106   :  { %436 = dma.done.wait [#allocation5], 128  }
 0x107   :  { %437 = vsyncadd [#allocation5], 4294967168 }
 0x108   :  { %257 = vsyncpa [#allocation4], 1 }
 0x109   :  { %258 = vsyncpa [#allocation7], 1 }
 0x10a   :  { %259 = vsyncpa [#allocation5], 1 }

</bundles_post_ra>
